<compile_context>
chip_gen: v7x
topology: tpu7x:2x2x1
jax: 0.10.0
libtpu: 0.0.40
codegen_flags: <defaults>
</compile_context>

<pallas_src>
import functools

import numpy as np
import jax
import jax.numpy as jnp
from jax.experimental import pallas as pl
from jax.experimental.pallas import tpu as pltpu

# ----------------------------------------------------------------------------
# Tables from the reference implementation (conf / loss_div_wd).
# ----------------------------------------------------------------------------
CONF_TABLE = np.float32([
    1, 0.9991138577461243, 0.8724386692047119, 0.8048540353775024,
    0.7398145198822021, 0.6715637445449829, 0.5973713397979736,
    0.5154045820236206, 0.42423248291015625, 0.3226756751537323,
    0.20976418256759644, 0.08473344892263412, -0.05296758562326431,
    -0.2036692053079605, -0.3674810528755188, -0.5443023443222046,
    -0.7338425517082214, -0.9356498718261719, -1.149145483970642,
    -1.3736592531204224, -1.6084641218185425, -1.8528070449829102,
    -2.1059343814849854, -2.367111921310425, -2.6356399059295654,
    -2.910861015319824, -3.1921679973602295, -3.479003667831421,
    -3.770861864089966, -4.067285060882568, -4.367861747741699,
    -4.67222261428833])

LOSS_DIV_WD = np.float32([
    -1000, -0.7357585932962737, -0.7292385198866751, -0.7197861042909649,
    -0.7060825529685993, -0.6862159572880272, -0.6574145455480526,
    -0.6156599675844636, -0.5551266577364037, -0.46736905653740307,
    -0.34014329294487, -0.15569892914556094, 0.11169756647530316,
    0.4993531412919867, 1.0613531942004133, 1.8761075276533326,
    3.0572900212223724, 4.769698321281568, 7.252246278161051,
    10.851297017399714, 16.06898724880869, 23.63328498268829,
    34.599555050301056, 50.497802769609315, 73.54613907594951,
    106.96024960367691, 155.40204460004963, 225.63008495214464,
    327.4425312511471, 475.0441754009414, 689.0282819387658, 999.249744])

# Constants of OptimalConf.__init__ (deterministic, derived from the tables).
_LOG_L = np.log(LOSS_DIV_WD[1:] + np.float32(0.750256)).astype(np.float32)
_STEP = (_LOG_L[-1] - _LOG_L[0]) / (len(_LOG_L) - 1)
LOG_STEP = float(_STEP * (len(_LOG_L) - 1) / 2.0)
LOG_OFFSET = float(_LOG_L[0] + LOG_STEP)
TABLE_LEN = 31  # conf[1:]


# ----------------------------------------------------------------------------
# Pallas kernel: per-tile CE + grid_sample-style 1D interp + running sum.
# ----------------------------------------------------------------------------
def _dsl_kernel(preds_ref, labels_ref, table_ref, out_ref, acc_ref, *,
                n_total, wd_ins, wd_cls, same_wd, needs_mask):
    pid = pl.program_id(0)

    @pl.when(pid == 0)
    def _init():
        acc_ref[...] = jnp.zeros_like(acc_ref)

    # bf16/f32 on the wire, f32 for all compute (v5e has no bf16 VALU/EUP).
    preds = preds_ref[...].astype(jnp.float32)          # (TN, C)
    labels = labels_ref[...]                             # (TN, 1) int32
    tn, c = preds.shape

    # ---- per-sample cross entropy: logsumexp - logit[label] ----
    cls_iota = jax.lax.broadcasted_iota(jnp.int32, (tn, c), 1)
    row_max = jnp.max(preds, axis=-1, keepdims=True)
    lse = row_max + jnp.log(
        jnp.sum(jnp.exp(preds - row_max), axis=-1, keepdims=True))
    # where-select (no one-hot materialize / multiply, no NaN from 0*(-inf)).
    picked = jnp.sum(jnp.where(cls_iota == labels, preds, jnp.float32(0.0)),
                     axis=-1, keepdims=True)
    loss = lse - picked                                   # (TN, 1)

    table = table_ref[...]                                # (1, TABLE_LEN)
    bins = jax.lax.broadcasted_iota(
        jnp.int32, (tn, TABLE_LEN), 1).astype(jnp.float32)

    # ---- OptimalConf (== F.grid_sample, 1D, border padding, align_corners) ----
    # Returns the *pre-exp* interpolated log-confidence so the exp() of both
    # factors can be fused into a single transcendental by the caller.
    def optimal_conf_val(loss_v, wd):
        l = loss_v * jnp.float32(1.0 / wd)
        # isnan guard of the PyTorch code dropped: CE loss >= 0 so the log
        # argument is always > 0 here.
        t = (jnp.log(l + jnp.float32(0.750256)) - jnp.float32(LOG_OFFSET)) \
            * jnp.float32(1.0 / LOG_STEP)
        ix = (t + jnp.float32(1.0)) * jnp.float32(0.5 * (TABLE_LEN - 1))
        ix = jnp.clip(ix, jnp.float32(0.0), jnp.float32(TABLE_LEN - 1))  # border
        # Linear-interpolation "hat" weights: max(0, 1 - |ix - j|).  Weights at
        # floor(ix) and floor(ix)+1 are (1-frac, frac); everything else is 0.
        w = jnp.maximum(jnp.float32(1.0) - jnp.abs(ix - bins), jnp.float32(0.0))
        return jnp.sum(table * w, axis=-1, keepdims=True)    # (TN, 1)

    # expectation = Constant(0) -> threshold = 0, so both confs use raw loss.
    if same_wd:
        log_conf = jnp.float32(2.0) * optimal_conf_val(loss, wd_ins)
    else:
        log_conf = optimal_conf_val(loss, wd_ins) + optimal_conf_val(loss, wd_cls)
    conf = jnp.exp(log_conf)                              # single EUP exp

    weighted = loss * conf                                # (TN, 1)

    if needs_mask:
        # zero out contributions of padded rows in the partial last tile
        row = pid * tn + jax.lax.broadcasted_iota(jnp.int32, (tn, 1), 0)
        weighted = jnp.where(row < n_total, weighted, jnp.float32(0.0))

    acc_ref[...] += jnp.sum(weighted, axis=0, keepdims=True)

    @pl.when(pid == pl.num_programs(0) - 1)
    def _finalize():
        out_ref[...] = acc_ref[...] * jnp.float32(1.0 / n_total)


def dynamic_super_loss(preds, labels, indices=None, *, wd_ins=0.25,
                       wd_cls=0.25, max_rows_per_tile=512):
    """preds: (N, C) float (f32 or bf16), labels: (N,) int,
    indices: (N,) int (unused, smoothing=0)."""
    del indices  # Smoother(smoothing=0) is the identity
    n, c = preds.shape
    if not jnp.issubdtype(preds.dtype, jnp.floating):
        preds = preds.astype(jnp.float32)
    labels2d = labels.reshape(n, 1).astype(jnp.int32)
    table = jnp.asarray(CONF_TABLE[1:]).reshape(1, TABLE_LEN)

    # ---- batch-tile sizing ------------------------------------------------
    # Budget the *whole* per-tile working set, not just the input DMA buffer:
    #   2x double-buffered preds tile (native dtype)
    # + ~4x (TN, C) f32 intermediates (cast preds, exp, iota/compare temps)
    # + ~4x (TN, 31) f32 conf intermediates.
    itemsize = jnp.dtype(preds.dtype).itemsize
    per_row_working = 2 * c * itemsize + 4 * c * 4 + 4 * TABLE_LEN * 4 + 64
    working_budget = 20 << 20                   # bytes; safe on v7x 64 MiB VMEM
    tn = min(int(max_rows_per_tile), max(8, working_budget // per_row_working))
    tn = max(8, (tn // 8) * 8)                  # (8,128) sublane constraint
    if tn >= n:
        tn = n                                  # block == full dim is legal
    num_tiles = pl.cdiv(n, tn)

    # Scoped-VMEM limit with headroom over the estimated working set.
    vmem_needed = tn * per_row_working + 4 * TABLE_LEN + 8192
    vmem_limit = int(min(max(vmem_needed + (vmem_needed >> 1) + (4 << 20),
                             16 << 20), 48 << 20))

    kernel = functools.partial(
        _dsl_kernel,
        n_total=n,
        wd_ins=float(wd_ins),
        wd_cls=float(wd_cls),
        same_wd=(float(wd_ins) == float(wd_cls)),
        needs_mask=(n % tn != 0),
    )

    # NOTE: the running-sum scratch creates a cross-step dependence, so the
    # batch axis is "arbitrary".  (On v7x one could emit per-tile partials on a
    # "parallel" axis and reduce in the wrapper; kept serial for correctness.)
    out = pl.pallas_call(
        kernel,
        out_shape=jax.ShapeDtypeStruct((1, 1), jnp.float32),
        grid=(num_tiles,),
        in_specs=[
            pl.BlockSpec((tn, c), lambda i: (i, 0)),
            pl.BlockSpec((tn, 1), lambda i: (i, 0)),
            pl.BlockSpec((1, TABLE_LEN), lambda i: (0, 0)),
        ],
        out_specs=pl.BlockSpec((1, 1), lambda i: (0, 0)),
        scratch_shapes=[pltpu.VMEM((1, 1), jnp.float32)],
        compiler_params=pltpu.CompilerParams(
            dimension_semantics=("arbitrary",),
            vmem_limit_bytes=vmem_limit),
    )(preds, labels2d, table)
    return out[0, 0]


# ----------------------------------------------------------------------------
# Pure-JAX reference (mirrors the PyTorch forward) for a sanity check.
# ----------------------------------------------------------------------------
def _reference(preds, labels, wd_ins, wd_cls):
    preds = preds.astype(jnp.float32)
    lse = jax.scipy.special.logsumexp(preds, axis=-1)
    picked = jnp.take_along_axis(preds, labels[:, None], axis=-1)[:, 0]
    lb = lse - picked

    def oc(loss, wd):
        t = (jnp.log(loss / wd + 0.750256) - LOG_OFFSET) / LOG_STEP
        t = jnp.where(jnp.isnan(t), -1.0, t)
        ix = jnp.clip((t + 1.0) * 0.5 * (TABLE_LEN - 1), 0.0, TABLE_LEN - 1)
        i0 = jnp.floor(ix).astype(jnp.int32)
        i1 = jnp.minimum(i0 + 1, TABLE_LEN - 1)
        w = ix - i0
        tab = jnp.asarray(CONF_TABLE[1:])
        return jnp.exp(tab[i0] * (1.0 - w) + tab[i1] * w)

    conf = oc(lb, wd_ins) * oc(lb, wd_cls)
    return jnp.mean(lb * conf)


if __name__ == "__main__":
    key = jax.random.PRNGKey(0)
    N, C = 8, 16          # batch of 8, ncls = 16
    NSAMPLES = 64         # number of training instances (for `indices`)
    WD_INS, WD_CLS = 0.25, 0.25

    k1, k2, k3, k4, k5 = jax.random.split(key, 5)
    preds = jax.random.normal(k1, (N, C), dtype=jnp.float32)
    labels = jax.random.randint(k2, (N,), 0, C, dtype=jnp.int32)
    indices = jax.random.randint(k3, (N,), 0, NSAMPLES, dtype=jnp.int32)

    # 1) small f32 case (single tile)
    loss = dynamic_super_loss(preds, labels, indices,
                              wd_ins=WD_INS, wd_cls=WD_CLS)
    loss = jax.block_until_ready(loss)
    ref = jax.block_until_ready(_reference(preds, labels, WD_INS, WD_CLS))
    np.testing.assert_allclose(np.asarray(loss), np.asarray(ref),
                               rtol=1e-5, atol=1e-5)

    # 2) multi-tile case with a partial last tile (exercises the grid + mask)
    N2 = 20
    preds2 = jax.random.normal(k4, (N2, C), dtype=jnp.float32)
    labels2 = jax.random.randint(k5, (N2,), 0, C, dtype=jnp.int32)
    loss2 = jax.block_until_ready(
        dynamic_super_loss(preds2, labels2, None, wd_ins=WD_INS, wd_cls=WD_CLS,
                           max_rows_per_tile=8))
    ref2 = jax.block_until_ready(_reference(preds2, labels2, WD_INS, WD_CLS))
    np.testing.assert_allclose(np.asarray(loss2), np.asarray(ref2),
                               rtol=1e-5, atol=1e-5)

    # 3) bf16-on-the-wire (kernel casts to f32 internally), distinct wd values
    preds_bf16 = preds.astype(jnp.bfloat16)
    loss3 = jax.block_until_ready(
        dynamic_super_loss(preds_bf16, labels, indices,
                           wd_ins=WD_INS, wd_cls=0.5))
    ref3 = jax.block_until_ready(_reference(preds_bf16, labels, WD_INS, 0.5))
    np.testing.assert_allclose(np.asarray(loss3), np.asarray(ref3),
                               rtol=1e-5, atol=1e-5)

    print("KERNEL_OK")
</pallas_src>

<mosaic_0001>
module attributes {stable_mosaic.version = 11 : i64} {
  func.func @_dsl_kernel(%arg0: i32, %arg1: memref<8x16xf32, #tpu.memory_space<vmem>>, %arg2: memref<8x1xi32, #tpu.memory_space<vmem>>, %arg3: memref<1x31xf32, #tpu.memory_space<vmem>>, %arg4: memref<1x1xf32, #tpu.memory_space<vmem>>, %arg5: memref<1x1xf32, #tpu.memory_space<vmem>>) attributes {dimension_semantics = [#tpu.dimension_semantics<arbitrary>], iteration_bounds = array<i64: 1>, scalar_prefetch = 0 : i64, scratch_operands = 1 : i64, tpu.core_type = #tpu.core_type<tc>, window_params = [{transform_indices = @transform_0, window_bounds = array<i64: 8, 16>}, {transform_indices = @transform_1, window_bounds = array<i64: 8, 1>}, {pipeline_mode = #tpu.pipeline_mode<synchronous>, transform_indices = @transform_2, window_bounds = array<i64: 1, 31>}, {pipeline_mode = #tpu.pipeline_mode<synchronous>, transform_indices = @transform_3, window_bounds = array<i64: 1, 1>}]} {
    %c0_i32 = arith.constant 0 : i32
    %0 = arith.cmpi eq, %arg0, %c0_i32 : i32
    %1 = arith.extui %0 : i1 to i32
    %c0_i32_0 = arith.constant 0 : i32
    %2 = arith.cmpi ne, %1, %c0_i32_0 : i32
    scf.if %2 {
      %cst_28 = arith.constant 0.000000e+00 : f32
      %65 = vector.broadcast %cst_28 : f32 to vector<1x1xf32>
      %c0_29 = arith.constant 0 : index
      %c0_30 = arith.constant 0 : index
      %66 = vector.load %arg5[%c0_29, %c0_30] : memref<1x1xf32, #tpu.memory_space<vmem>>, vector<1x1xf32>
      tpu.vector_store %arg5[%c0_29, %c0_30], %65 {strides = array<i32>} : memref<1x1xf32, #tpu.memory_space<vmem>>, vector<1x1xf32>,
    } else {
    }
    %c0 = arith.constant 0 : index
    %c0_1 = arith.constant 0 : index
    %3 = vector.load %arg1[%c0, %c0_1] : memref<8x16xf32, #tpu.memory_space<vmem>>, vector<8x16xf32>
    %c0_2 = arith.constant 0 : index
    %c0_3 = arith.constant 0 : index
    %4 = vector.load %arg2[%c0_2, %c0_3] : memref<8x1xi32, #tpu.memory_space<vmem>>, vector<8x1xi32>
    %5 = tpu.iota {dimensions = array<i32: 1>} : vector<8x16xi32>
    %cst = arith.constant dense<0xFF800000> : vector<8xf32>
    %6 = vector.multi_reduction <maximumf>, %3, %cst [1] : vector<8x16xf32> to vector<8xf32>
    %7 = vector.shape_cast %6 : vector<8xf32> to vector<8x1xf32>
    %8 = vector.broadcast %7 : vector<8x1xf32> to vector<8x16xf32>
    %9 = arith.subf %3, %8 : vector<8x16xf32>
    %10 = math.exp %9 : vector<8x16xf32>
    %cst_4 = arith.constant dense<0.000000e+00> : vector<8xf32>
    %11 = vector.multi_reduction <add>, %10, %cst_4 [1] : vector<8x16xf32> to vector<8xf32>
    %12 = vector.shape_cast %11 : vector<8xf32> to vector<8x1xf32>
    %13 = math.log %12 : vector<8x1xf32>
    %14 = arith.addf %7, %13 : vector<8x1xf32>
    %15 = vector.broadcast %4 : vector<8x1xi32> to vector<8x16xi32>
    %16 = arith.cmpi eq, %5, %15 : vector<8x16xi32>
    %cst_5 = arith.constant 0.000000e+00 : f32
    %17 = vector.broadcast %cst_5 : f32 to vector<8x16xf32>
    %18 = arith.select %16, %3, %17 : vector<8x16xi1>, vector<8x16xf32>
    %cst_6 = arith.constant dense<0.000000e+00> : vector<8xf32>
    %19 = vector.multi_reduction <add>, %18, %cst_6 [1] : vector<8x16xf32> to vector<8xf32>
    %20 = vector.shape_cast %19 : vector<8xf32> to vector<8x1xf32>
    %21 = arith.subf %14, %20 : vector<8x1xf32>
    %c0_7 = arith.constant 0 : index
    %c0_8 = arith.constant 0 : index
    %22 = vector.load %arg3[%c0_7, %c0_8] : memref<1x31xf32, #tpu.memory_space<vmem>>, vector<1x31xf32>
    %23 = tpu.iota {dimensions = array<i32: 1>} : vector<8x31xi32>
    %24 = arith.sitofp %23 : vector<8x31xi32> to vector<8x31xf32>
    %cst_9 = arith.constant 4.000000e+00 : f32
    %25 = vector.broadcast %cst_9 : f32 to vector<8x1xf32>
    %26 = arith.mulf %21, %25 : vector<8x1xf32>
    %cst_10 = arith.constant 7.502560e-01 : f32
    %27 = vector.broadcast %cst_10 : f32 to vector<8x1xf32>
    %28 = arith.addf %26, %27 : vector<8x1xf32>
    %29 = math.log %28 : vector<8x1xf32>
    %cst_11 = arith.constant 1.33698463 : f32
    %30 = vector.broadcast %cst_11 : f32 to vector<8x1xf32>
    %31 = arith.subf %29, %30 : vector<8x1xf32>
    %cst_12 = arith.constant 0.179508373 : f32
    %32 = vector.broadcast %cst_12 : f32 to vector<8x1xf32>
    %33 = arith.mulf %31, %32 : vector<8x1xf32>
    %cst_13 = arith.constant 1.000000e+00 : f32
    %34 = vector.broadcast %cst_13 : f32 to vector<8x1xf32>
    %35 = arith.addf %33, %34 : vector<8x1xf32>
    %cst_14 = arith.constant 1.500000e+01 : f32
    %36 = vector.broadcast %cst_14 : f32 to vector<8x1xf32>
    %37 = arith.mulf %35, %36 : vector<8x1xf32>
    %cst_15 = arith.constant 0.000000e+00 : f32
    %cst_16 = arith.constant 3.000000e+01 : f32
    %38 = vector.broadcast %cst_15 : f32 to vector<8x1xf32>
    %39 = arith.maximumf %38, %37 : vector<8x1xf32>
    %40 = vector.broadcast %cst_16 : f32 to vector<8x1xf32>
    %41 = arith.minimumf %40, %39 : vector<8x1xf32>
    %42 = vector.broadcast %41 : vector<8x1xf32> to vector<8x31xf32>
    %43 = arith.subf %42, %24 : vector<8x31xf32>
    %44 = math.absf %43 : vector<8x31xf32>
    %cst_17 = arith.constant 1.000000e+00 : f32
    %45 = vector.broadcast %cst_17 : f32 to vector<8x31xf32>
    %46 = arith.subf %45, %44 : vector<8x31xf32>
    %cst_18 = arith.constant 0.000000e+00 : f32
    %47 = vector.broadcast %cst_18 : f32 to vector<8x31xf32>
    %48 = arith.maximumf %46, %47 : vector<8x31xf32>
    %49 = vector.broadcast %22 : vector<1x31xf32> to vector<8x31xf32>
    %50 = arith.mulf %49, %48 : vector<8x31xf32>
    %cst_19 = arith.constant dense<0.000000e+00> : vector<8xf32>
    %51 = vector.multi_reduction <add>, %50, %cst_19 [1] : vector<8x31xf32> to vector<8xf32>
    %52 = vector.shape_cast %51 : vector<8xf32> to vector<8x1xf32>
    %cst_20 = arith.constant 2.000000e+00 : f32
    %53 = vector.broadcast %cst_20 : f32 to vector<8x1xf32>
    %54 = arith.mulf %53, %52 : vector<8x1xf32>
    %55 = math.exp %54 : vector<8x1xf32>
    %56 = arith.mulf %21, %55 : vector<8x1xf32>
    %c0_21 = arith.constant 0 : index
    %c0_22 = arith.constant 0 : index
    %57 = vector.load %arg5[%c0_21, %c0_22] : memref<1x1xf32, #tpu.memory_space<vmem>>, vector<1x1xf32>
    %cst_23 = arith.constant dense<0.000000e+00> : vector<1xf32>
    %58 = vector.multi_reduction <add>, %56, %cst_23 [0] : vector<8x1xf32> to vector<1xf32>
    %59 = vector.shape_cast %58 : vector<1xf32> to vector<1x1xf32>
    %60 = arith.addf %57, %59 : vector<1x1xf32>
    %c0_24 = arith.constant 0 : index
    %c0_25 = arith.constant 0 : index
    %61 = vector.load %arg5[%c0_24, %c0_25] : memref<1x1xf32, #tpu.memory_space<vmem>>, vector<1x1xf32>
    tpu.vector_store %arg5[%c0_24, %c0_25], %60 {strides = array<i32>} : memref<1x1xf32, #tpu.memory_space<vmem>>, vector<1x1xf32>,
    %c0_i32_26 = arith.constant 0 : i32
    %62 = arith.cmpi eq, %arg0, %c0_i32_26 : i32
    %63 = arith.extui %62 : i1 to i32
    %c0_i32_27 = arith.constant 0 : i32
    %64 = arith.cmpi ne, %63, %c0_i32_27 : i32
    scf.if %64 {
      %c0_28 = arith.constant 0 : index
      %c0_29 = arith.constant 0 : index
      %65 = vector.load %arg5[%c0_28, %c0_29] : memref<1x1xf32, #tpu.memory_space<vmem>>, vector<1x1xf32>
      %cst_30 = arith.constant 1.250000e-01 : f32
      %66 = vector.broadcast %cst_30 : f32 to vector<1x1xf32>
      %67 = arith.mulf %65, %66 : vector<1x1xf32>
      %c0_31 = arith.constant 0 : index
      %c0_32 = arith.constant 0 : index
      %68 = vector.load %arg4[%c0_31, %c0_32] : memref<1x1xf32, #tpu.memory_space<vmem>>, vector<1x1xf32>
      tpu.vector_store %arg4[%c0_31, %c0_32], %67 {strides = array<i32>} : memref<1x1xf32, #tpu.memory_space<vmem>>, vector<1x1xf32>,
    } else {
    }
    return
  }
  func.func @transform_0(%arg0: i32) -> (i32, i32) {
    %c0_i32 = arith.constant 0 : i32
    %c0_i32_0 = arith.constant 0 : i32
    return %arg0, %c0_i32 : i32, i32
  }
  func.func @transform_1(%arg0: i32) -> (i32, i32) {
    %c0_i32 = arith.constant 0 : i32
    %c0_i32_0 = arith.constant 0 : i32
    return %arg0, %c0_i32 : i32, i32
  }
  func.func @transform_2(%arg0: i32) -> (i32, i32) {
    %c0_i32 = arith.constant 0 : i32
    %c0_i32_0 = arith.constant 0 : i32
    %c0_i32_1 = arith.constant 0 : i32
    return %c0_i32, %c0_i32_0 : i32, i32
  }
  func.func @transform_3(%arg0: i32) -> (i32, i32) {
    %c0_i32 = arith.constant 0 : i32
    %c0_i32_0 = arith.constant 0 : i32
    %c0_i32_1 = arith.constant 0 : i32
    return %c0_i32, %c0_i32_0 : i32, i32
  }
}

</mosaic_0001>

<bundles_post_ra>
// kernel: tpu_custom_call.1
= control target key start
LH: loop header
LB: loop body
LE: loop exit
PB: predicated region body
PF: predicated region fallthrough
CT: control target
= control target key end

     0   :  { %vm25_vm0 = vcmask 130048   ;;  %s196_s0 = inlined_call_operand.vmem [shape: f32[8,16], index: 0, kind: input, shape index: {}]   ;;  %s197_s1 = inlined_call_operand.vmem [shape: s32[8,1], index: 1, kind: input, shape index: {}]   ;;  %s198_s2 = inlined_call_operand.vmem [shape: f32[1,31], index: 2, kind: input, shape index: {}]   ;;  %s199_s3 = inlined_call_operand.hbm [shape: f32[1,1], index: 3, kind: output, shape index: {}]  }
   0x1   :  { %v21_v0 = vld [vmem:[%s196_s0] sm:$0xff] }
   0x2   :  { %8 = vsyncpa [#allocation4], 0  ;;  %v26_v1 = vsel %vm25_vm0, %v21_v0, -inf  ;;  %v146_v2 = vmov 0   ;;  %v22_v3 = vld [vmem:[%s197_s1] sm:$0xff]  ;;  %v23_v7 = vlaneseq  ;;  %vm70_vm2 = vcmask 252928  }
   0x3   :  { %113 = vset.pattern.permute.xlu0 %v146_v2  ;;  %v109_v34 = vld [vmem:[%s198_s2] ss:$0 sm:$0xff]  ;;  %vm19_vm3 = vcmask 0   ;;  %v147_v38 = vmov 0.0   ;;  %s148_s2 = smov [#allocation3]  }
   0x4   :  { %27 = vmax.xlane.f32.xlu0 %v26_v1  ;;  %v24_v8 = vand.u32 127, %v23_v7  ;;  %20 = vst.msk [vmem:[#allocation2] sm:$0x1] %vm19_vm3, %v147_v38  ;;  %s100_s16 = sshll.u32 %s148_s2, 4  ;;  %s101_s16 = int_to_ptr.vmem [resolvable:$true] %s100_s16 }
   0x5   :  { %s122_s17 = scalar_lea.vmem %s101_s16, 16  ;;  %s126_s18 = scalar_lea.vmem %s101_s16, 32 }
   0x6   :  { %v48_v28 = vcvt.s32.f32 %v24_v8  ;;  %p123_p0 = scmp.ne.s32.totalorder %s101_s16, %s122_s17  ;;  %p127_p1 = scmp.lt.s32.totalorder %s101_s16, %s101_s16 }
   0x7   :  { %p128_p2 = scmp.lt.s32.totalorder %s126_s18, %s122_s17 }
   0x9   :  { %p129_p3 = por %p128_p2, %p127_p1 }
   0xb   :  { %v78_v49 = vld [vmem:[#allocation2] sm:$0x1]  ;;  %p130_p4 = pnand %p129_p3, %p123_p0 }
  0x1a   :  { %39 = vperm.xlu0 %113, %v22_v3  }
  0x91   :  { %v28_v4 = vpop.xlane.xlu0 %27 }
  0x92   :  { %v29_v5 = vsub.f32 %v21_v0, %v28_v4 }
  0x94   :  { %v30_v6 = vmul.f32 1.442695, %v29_v5 }
  0x96   :  { %114 = vpow2.f32 %v30_v6 }
  0x99   :  { %v40_v9 = vpop.permute.xlu0 %39 }
  0x9a   :  { %vm41_vm1 = vcmp.eq.s32.totalorder %v24_v8, %v40_v9 }
  0x9b   :  { %v42_v11 = vsel %vm41_vm1, %v21_v0, 0.0 }
  0x9c   :  { %v43_v13 = vsel %vm25_vm0, %v42_v11, 0.0 }
  0xa0   :  { %v115_v10 = vpop.eup %114 }
  0xa1   :  { %v32_v12 = vsel %vm25_vm0, %v115_v10, 0.0 }
  0xa2   :  { %33 = vadd.xlane.f32.xlu1 %v32_v12 }
  0xa6   :  { %44 = vadd.xlane.f32.xlu1 %v43_v13 }
 0x12f   :  { %v34_v14 = vpop.xlane.xlu1 %33 }
 0x130   :  { %116 = vlog2.f32 %v34_v14 }
 0x133   :  { %v45_v17 = vpop.xlane.xlu1 %44 }
 0x13a   :  { %v117_v15 = vpop.eup %116 }
 0x13b   :  { %v36_v16 = vmul.f32 0.6931472, %v117_v15 }
 0x13d   :  { %v37_v18 = vadd.f32 %v36_v16, %v28_v4 }
 0x13f   :  { %v46_v19 = vsub.f32 %v37_v18, %v45_v17 }
 0x141   :  { %v49_v20 = vmul.f32 4.0, %v46_v19 }
 0x143   :  { %v50_v21 = vadd.f32 0.750256, %v49_v20 }
 0x145   :  { %118 = vlog2.f32 %v50_v21 }
 0x14f   :  { %v119_v22 = vpop.eup %118 }
 0x150   :  { %v52_v23 = vmul.f32 0.6931472, %v119_v22 }
 0x152   :  { %v108_v24 = vadd.f32 -1.3369846, %v52_v23 }
 0x154   :  { %v54_v25 = vmul.f32 0.17950837, %v108_v24 }
 0x156   :  { %v55_v26 = vadd.f32 1.0, %v54_v25 }
 0x158   :  { %v56_v27 = vmul.f32 15.0, %v55_v26 }
 0x15a   :  { %v57_v29 = vmax.f32 %v56_v27, 0.0 }
 0x15c   :  { %v58_v30 = vmin.f32 %v57_v29, 30.0 }
 0x15e   :  { %v59_v31 = vsub.f32 %v58_v30, %v48_v28 }
 0x160   :  { %v60_v32 = vand.u32 2147483647, %v59_v31 }
 0x162   :  { %v61_v33 = vsub.f32 1.0, %v60_v32 }
 0x164   :  { %v62_v35 = vmax.f32 %v61_v33, 0.0 }
 0x166   :  { %v69_v36 = vmul.f32 %v109_v34, %v62_v35 }
 0x168   :  { %v71_v37 = vsel %vm70_vm2, %v69_v36, 0.0 }
 0x169   :  { %72 = vadd.xlane.f32.xlu1 %v71_v37 }
 0x1f6   :  { %v73_v39 = vpop.xlane.xlu1 %72 }
 0x1f7   :  { %v74_v40 = vmul.f32 2.0, %v73_v39 }
 0x1f9   :  { %v75_v41 = vmul.f32 1.442695, %v74_v40 }
 0x1fb   :  { %120 = vpow2.f32 %v75_v41 }
 0x205   :  { %v121_v42 = vpop.eup %120 }
 0x206   :  { %v77_v43 = vmul.f32 %v121_v42, %v46_v19 }
 0x208   :  { %v79_v44 = vrot.slane %v77_v43, 4 }
 0x20a   :  { %v80_v45 = vadd.f32 %v79_v44, %v77_v43 }
 0x20c   :  { %v81_v46 = vrot.slane %v80_v45, 2 }
 0x20e   :  { %v82_v47 = vadd.f32 %v81_v46, %v80_v45 }
 0x210   :  { %v83_v48 = vrot.slane %v82_v47, 1 }
 0x212   :  { %v84_v50 = vadd.f32 %v83_v48, %v82_v47 }
 0x214   :  { %v85_v51 = vadd.f32 %v84_v50, %v78_v49 }
 0x216   :  { %87 = vst.msk [vmem:[#allocation2] sm:$0x1] %vm19_vm3, %v85_v51 }
 0x21d   :  { %v91_v52 = vld [vmem:[#allocation2] sm:$0x1] }
 0x21e   :  { %v92_v53 = vmul.f32 0.125, %v91_v52 }
 0x220   :  { %93 = vst.msk [vmem:[#allocation3] sm:$0x1] %vm19_vm3, %v92_v53 }
 0x221   :  { %133 = shalt.err (!%p130_p4)
}
 0x222   :  { %s134_s21 = scalar_lea.hbm %s199_s3, 16 }
 0x223   :  { %p135_p5 = scmp.ne.s32.totalorder %s199_s3, %s134_s21  ;;  %p138_p6 = scmp.lt.u32.totalorder %s134_s21, %s199_s3 }
 0x225   :  { %p140_p7 = pnand %p138_p6, %p135_p5 }
 0x227   :  { %143 = shalt.err (!%p140_p7)
}
 0x228   :  { %103 = dma.vmem_to_hbm [thread:$0]  %s101_s16, 16, %s199_s3, [#allocation4]  }
 0x229   :  { %144 = dma.done.wait [#allocation4], 16  }
 0x22a   :  { %145 = vsyncadd [#allocation4], 4294967280 }
 0x22b   :  { %107 = vsyncpa [#allocation4], 1 }

</bundles_post_ra>
